<compile_context>
chip_gen: v7x
topology: tpu7x:2x2x1
jax: 0.10.0
libtpu: 0.0.40
codegen_flags: <defaults>
</compile_context>

<pallas_src>
import functools

import jax
import jax.numpy as jnp
from jax.experimental import pallas as pl
from jax.experimental.pallas import tpu as pltpu


TM = 512          # preferred row tile for dense / dense_add_ln (fits v7x budget)
LN_ROWS = 1024    # standalone LayerNorm row tile (HBM-bound; bigger amortizes better)
VMEM_LIMIT = 48 * 1024 * 1024  # > 32 MiB scoped default, < v7x 64 MiB physical


def _row_tile(m, pref):
    """Largest 8-aligned divisor of m that is <= pref (full m if m <= pref)."""
    if m <= pref:
        return m
    t = (pref // 8) * 8
    while t >= 8:
        if m % t == 0:
            return t
        t -= 8
    return m  # no aligned divisor (odd m); fall back to a single block


# ----------------------------------------------------------------------------
# Pallas kernels
# ----------------------------------------------------------------------------
def _dense_kernel(x_ref, w_ref, b_ref, o_ref, *, activation):
    """Weight-resident matmul; bias (+ optional GELU) epilogue."""
    y = jnp.dot(x_ref[...], w_ref[...], preferred_element_type=jnp.float32)
    y = y + b_ref[...]
    if activation == "gelu":
        # tanh-approx GELU ("gelu_new"); PyTorch nn.GELU() default is exact erf --
        # small systematic difference, loosen comparison tolerance accordingly.
        c = jnp.float32(0.7978845608028654)  # sqrt(2/pi)
        y = 0.5 * y * (1.0 + jnp.tanh(c * (y + 0.044715 * y * y * y)))
    o_ref[...] = y.astype(o_ref.dtype)


def _dense_add_ln_kernel(x_ref, w_ref, b_ref, r_ref, g_ref, be_ref,
                         o32_ref, o16_ref):
    """Weight-resident matmul fused with bias + residual add + LayerNorm.

    Emits an f32 copy (next residual) and a bf16 copy (next matmul input)."""
    y = jnp.dot(x_ref[...], w_ref[...], preferred_element_type=jnp.float32)
    y = y + b_ref[...] + r_ref[...]
    mean = jnp.mean(y, axis=-1, keepdims=True)
    var = jnp.mean((y - mean) * (y - mean), axis=-1, keepdims=True)
    yn = (y - mean) * jax.lax.rsqrt(var + 1e-12)
    out = yn * g_ref[...] + be_ref[...]
    o32_ref[...] = out
    o16_ref[...] = out.astype(jnp.bfloat16)


def _layernorm_kernel(x_ref, g_ref, b_ref, o32_ref, o16_ref):
    """Plain LayerNorm over row tiles; emits f32 + bf16 copies."""
    x = x_ref[...]
    mean = jnp.mean(x, axis=-1, keepdims=True)
    var = jnp.mean((x - mean) * (x - mean), axis=-1, keepdims=True)
    xn = (x - mean) * jax.lax.rsqrt(var + 1e-12)
    out = xn * g_ref[...] + b_ref[...]
    o32_ref[...] = out
    o16_ref[...] = out.astype(jnp.bfloat16)


def _attention_kernel(qkv_ref, m_ref, o_ref, *, num_heads, scale):
    """One batch element per grid step, flat (S, 3H) QKV in, lane-dense (S, H) out.

    Heads are split by static lane slices on VMEM-resident data (no HBM transposes).
    Softmax normalization happens after the PV matmul; 1/sqrt(Dh) is folded into q.
    """
    seq, h3 = qkv_ref.shape
    hidden = h3 // 3
    dh = hidden // num_heads
    m = m_ref[0]  # (1, S) f32 additive mask, broadcast over query rows

    # TODO(synk): for S >= ~512 (v7x: ~384) switch to a KV-blocked online-softmax
    # (flash) form with a head grid axis so the per-head (S, S) scores stay small.
    for h in range(num_heads):
        q = qkv_ref[:, h * dh:(h + 1) * dh]                          # (S, Dh) bf16
        k = qkv_ref[:, hidden + h * dh:hidden + (h + 1) * dh]        # (S, Dh) bf16
        v = qkv_ref[:, 2 * hidden + h * dh:2 * hidden + (h + 1) * dh]

        qs = (q.astype(jnp.float32) * scale).astype(jnp.bfloat16)    # O(S*Dh) scale
        s = jax.lax.dot_general(qs, k, (((1,), (1,)), ((), ())),
                                preferred_element_type=jnp.float32)  # (S, S)
        s = s + m
        s = s - jnp.max(s, axis=-1, keepdims=True)
        p = jnp.exp(s)
        denom = jnp.sum(p, axis=-1, keepdims=True)                   # (S, 1)
        ctx = jnp.dot(p.astype(jnp.bfloat16), v,
                      preferred_element_type=jnp.float32)            # (S, Dh)
        ctx = ctx * pl.reciprocal(denom, approx=True)                # normalize post-PV
        o_ref[:, h * dh:(h + 1) * dh] = ctx.astype(o_ref.dtype)


# ----------------------------------------------------------------------------
# pallas_call wrappers
# ----------------------------------------------------------------------------
def dense(x, w, b, activation=None, out_dtype=jnp.bfloat16):
    """y = x @ w + b (+GELU). Weight kept VMEM-resident (K, N un-tiled)."""
    M, K = x.shape
    N = w.shape[1]
    tm = _row_tile(M, TM)
    # TODO(synk): add a K-accumulation fallback path for weights too large for VMEM.
    kern = functools.partial(_dense_kernel, activation=activation)
    return pl.pallas_call(
        kern,
        out_shape=jax.ShapeDtypeStruct((M, N), out_dtype),
        grid=(M // tm,),
        in_specs=[
            pl.BlockSpec((tm, K), lambda i: (i, 0)),
            pl.BlockSpec((K, N), lambda i: (0, 0)),   # constant index -> DMA'd once
            pl.BlockSpec((1, N), lambda i: (0, 0)),
        ],
        out_specs=pl.BlockSpec((tm, N), lambda i: (i, 0)),
        compiler_params=pltpu.CompilerParams(
            dimension_semantics=("parallel",),
            vmem_limit_bytes=VMEM_LIMIT,
        ),
    )(x, w, b.reshape(1, N))


def dense_add_ln(x, w, b, residual, gamma, beta):
    """(x @ w + b + residual) -> LayerNorm; returns (f32, bf16) copies."""
    M, K = x.shape
    N = w.shape[1]
    tm = _row_tile(M, TM)
    return pl.pallas_call(
        _dense_add_ln_kernel,
        out_shape=(jax.ShapeDtypeStruct((M, N), jnp.float32),
                   jax.ShapeDtypeStruct((M, N), jnp.bfloat16)),
        grid=(M // tm,),
        in_specs=[
            pl.BlockSpec((tm, K), lambda i: (i, 0)),
            pl.BlockSpec((K, N), lambda i: (0, 0)),   # weight-resident
            pl.BlockSpec((1, N), lambda i: (0, 0)),
            pl.BlockSpec((tm, N), lambda i: (i, 0)),
            pl.BlockSpec((1, N), lambda i: (0, 0)),
            pl.BlockSpec((1, N), lambda i: (0, 0)),
        ],
        out_specs=(pl.BlockSpec((tm, N), lambda i: (i, 0)),
                   pl.BlockSpec((tm, N), lambda i: (i, 0))),
        compiler_params=pltpu.CompilerParams(
            dimension_semantics=("parallel",),
            vmem_limit_bytes=VMEM_LIMIT,
        ),
    )(x, w, b.reshape(1, N), residual, gamma.reshape(1, N), beta.reshape(1, N))


def layernorm(x, gamma, beta):
    M, H = x.shape
    tm = _row_tile(M, LN_ROWS)
    return pl.pallas_call(
        _layernorm_kernel,
        out_shape=(jax.ShapeDtypeStruct((M, H), jnp.float32),
                   jax.ShapeDtypeStruct((M, H), jnp.bfloat16)),
        grid=(M // tm,),
        in_specs=[
            pl.BlockSpec((tm, H), lambda i: (i, 0)),
            pl.BlockSpec((1, H), lambda i: (0, 0)),
            pl.BlockSpec((1, H), lambda i: (0, 0)),
        ],
        out_specs=(pl.BlockSpec((tm, H), lambda i: (i, 0)),
                   pl.BlockSpec((tm, H), lambda i: (i, 0))),
        compiler_params=pltpu.CompilerParams(dimension_semantics=("parallel",)),
    )(x, gamma.reshape(1, H), beta.reshape(1, H))


def attention(qkv, mask_add, *, batch, seq, num_heads, scale):
    """qkv: (B*S, 3H) bf16; mask_add: (B, 1, S) f32 -> ctx: (B*S, H) bf16."""
    BS, H3 = qkv.shape
    H = H3 // 3
    kern = functools.partial(_attention_kernel, num_heads=num_heads, scale=scale)
    return pl.pallas_call(
        kern,
        out_shape=jax.ShapeDtypeStruct((BS, H), jnp.bfloat16),
        grid=(batch,),
        in_specs=[
            pl.BlockSpec((seq, H3), lambda b: (b, 0)),
            pl.BlockSpec((1, 1, seq), lambda b: (b, 0, 0)),
        ],
        out_specs=pl.BlockSpec((seq, H), lambda b: (b, 0)),
        compiler_params=pltpu.CompilerParams(
            dimension_semantics=("parallel",),
            vmem_limit_bytes=VMEM_LIMIT,
        ),
    )(qkv, mask_add)


# ----------------------------------------------------------------------------
# Mini-BERT + classifier forward (structure of SimpleBERTClassifier.forward)
# ----------------------------------------------------------------------------
def simple_bert_classifier(params, input_ids, attention_mask, *, num_heads):
    B, S = input_ids.shape
    H = params["tok_emb"].shape[1]
    Dh = H // num_heads
    scale = 1.0 / (Dh ** 0.5)

    # Embeddings (gather stays in XLA); LayerNorm emits f32 + bf16 copies.
    x = params["tok_emb"][input_ids] + params["pos_emb"][:S][None, :, :]
    x = x.reshape(B * S, H).astype(jnp.float32)
    x_f32, x_bf16 = layernorm(x, params["emb_ln_g"], params["emb_ln_b"])

    # Additive attention mask kept compact at (B, 1, S); never per-head.
    mask_add = ((1.0 - attention_mask.astype(jnp.float32)) * -1e9).reshape(B, 1, S)

    for layer in params["layers"]:
        # Fused QKV projection (weight-resident) straight into the attention kernel:
        # no XLA reshape/transpose glue in between.
        qkv = dense(x_bf16, layer["wqkv"], layer["bqkv"])               # (B*S, 3H) bf16
        ctx = attention(qkv, mask_add, batch=B, seq=S,
                        num_heads=num_heads, scale=scale)               # (B*S, H) bf16

        # Output projection fused with bias + residual add + LayerNorm.
        x_f32, x_bf16 = dense_add_ln(ctx, layer["wo"], layer["bo"], x_f32,
                                     layer["ln1_g"], layer["ln1_b"])

        # FFN: GELU fused in first matmul epilogue; bias+residual+LN in second.
        ff = dense(x_bf16, layer["w1"], layer["b1"], activation="gelu")
        x_f32, x_bf16 = dense_add_ln(ff, layer["w2"], layer["b2"], x_f32,
                                     layer["ln2_g"], layer["ln2_b"])

    # cls_output = last_hidden_state[:, 0, :]; classifier head in plain XLA
    # (N=2 output lanes is a poor fit for a pallas_call and the matmul is tiny).
    cls = x_f32.reshape(B, S, H)[:, 0, :]                               # (B, H) f32
    logits = jnp.dot(cls, params["wc"].astype(jnp.float32)) + params["bc"]
    return logits


# ----------------------------------------------------------------------------
# Deterministic parameter init (matmul weights stored bf16, (in, out) layout)
# ----------------------------------------------------------------------------
def init_params(key, *, vocab, max_pos, hidden, ffn, num_layers):
    keys = jax.random.split(key, 4 + num_layers)

    def nrm(k, shape, scale=0.02, dtype=jnp.float32):
        return (scale * jax.random.normal(k, shape, dtype=jnp.float32)).astype(dtype)

    params = {
        "tok_emb": nrm(keys[0], (vocab, hidden)),
        "pos_emb": nrm(keys[1], (max_pos, hidden)),
        "emb_ln_g": jnp.ones((hidden,), jnp.float32),
        "emb_ln_b": jnp.zeros((hidden,), jnp.float32),
        "wc": nrm(keys[2], (hidden, 2), dtype=jnp.bfloat16),
        "bc": jnp.zeros((2,), jnp.float32),
        "layers": [],
    }
    for l in range(num_layers):
        lk = jax.random.split(keys[4 + l], 4)
        params["layers"].append(
            {
                "wqkv": nrm(lk[0], (hidden, 3 * hidden), dtype=jnp.bfloat16),
                "bqkv": jnp.zeros((3 * hidden,), jnp.float32),
                "wo": nrm(lk[1], (hidden, hidden), dtype=jnp.bfloat16),
                "bo": jnp.zeros((hidden,), jnp.float32),
                "ln1_g": jnp.ones((hidden,), jnp.float32),
                "ln1_b": jnp.zeros((hidden,), jnp.float32),
                "w1": nrm(lk[2], (hidden, ffn), dtype=jnp.bfloat16),
                "b1": jnp.zeros((ffn,), jnp.float32),
                "w2": nrm(lk[3], (ffn, hidden), dtype=jnp.bfloat16),
                "b2": jnp.zeros((hidden,), jnp.float32),
                "ln2_g": jnp.ones((hidden,), jnp.float32),
                "ln2_b": jnp.zeros((hidden,), jnp.float32),
            }
        )
    return params


if __name__ == "__main__":
    B, S = 2, 8
    HIDDEN, NUM_HEADS, FFN, LAYERS = 32, 4, 64, 2
    VOCAB, MAX_POS = 100, 16

    key = jax.random.PRNGKey(0)
    pk, ik = jax.random.split(key)
    params = init_params(
        pk, vocab=VOCAB, max_pos=MAX_POS, hidden=HIDDEN, ffn=FFN, num_layers=LAYERS
    )

    input_ids = jax.random.randint(ik, (B, S), 0, VOCAB, dtype=jnp.int32)
    attention_mask = jnp.ones((B, S), dtype=jnp.int32).at[1, 6:].set(0)  # padded tail

    logits = simple_bert_classifier(
        params, input_ids, attention_mask, num_heads=NUM_HEADS
    )
    logits = jax.block_until_ready(logits)
    assert logits.shape == (B, 2) and logits.dtype == jnp.float32
    print("KERNEL_OK")
</pallas_src>

<mosaic_0001>
module attributes {stable_mosaic.version = 11 : i64} {
  func.func @_layernorm_kernel(%arg0: i32, %arg1: memref<16x32xf32, #tpu.memory_space<vmem>>, %arg2: memref<1x32xf32, #tpu.memory_space<vmem>>, %arg3: memref<1x32xf32, #tpu.memory_space<vmem>>, %arg4: memref<16x32xf32, #tpu.memory_space<vmem>>, %arg5: memref<16x32xbf16, #tpu.memory_space<vmem>>) attributes {dimension_semantics = [#tpu.dimension_semantics<parallel>], iteration_bounds = array<i64: 1>, scalar_prefetch = 0 : i64, scratch_operands = 0 : i64, tpu.core_type = #tpu.core_type<tc>, window_params = [{transform_indices = @transform_0, window_bounds = array<i64: 16, 32>}, {pipeline_mode = #tpu.pipeline_mode<synchronous>, transform_indices = @transform_1, window_bounds = array<i64: 1, 32>}, {pipeline_mode = #tpu.pipeline_mode<synchronous>, transform_indices = @transform_2, window_bounds = array<i64: 1, 32>}, {transform_indices = @transform_3, window_bounds = array<i64: 16, 32>}, {transform_indices = @transform_4, window_bounds = array<i64: 16, 32>}]} {
    %c0 = arith.constant 0 : index
    %c0_0 = arith.constant 0 : index
    %0 = vector.load %arg1[%c0, %c0_0] : memref<16x32xf32, #tpu.memory_space<vmem>>, vector<16x32xf32>
    %cst = arith.constant dense<0.000000e+00> : vector<16xf32>
    %1 = vector.multi_reduction <add>, %0, %cst [1] : vector<16x32xf32> to vector<16xf32>
    %2 = vector.shape_cast %1 : vector<16xf32> to vector<16x1xf32>
    %cst_1 = arith.constant 3.200000e+01 : f32
    %3 = vector.broadcast %cst_1 : f32 to vector<16x1xf32>
    %4 = arith.divf %2, %3 : vector<16x1xf32>
    %5 = vector.broadcast %4 : vector<16x1xf32> to vector<16x32xf32>
    %6 = arith.subf %0, %5 : vector<16x32xf32>
    %7 = vector.broadcast %4 : vector<16x1xf32> to vector<16x32xf32>
    %8 = arith.subf %0, %7 : vector<16x32xf32>
    %9 = arith.mulf %6, %8 : vector<16x32xf32>
    %cst_2 = arith.constant dense<0.000000e+00> : vector<16xf32>
    %10 = vector.multi_reduction <add>, %9, %cst_2 [1] : vector<16x32xf32> to vector<16xf32>
    %11 = vector.shape_cast %10 : vector<16xf32> to vector<16x1xf32>
    %cst_3 = arith.constant 3.200000e+01 : f32
    %12 = vector.broadcast %cst_3 : f32 to vector<16x1xf32>
    %13 = arith.divf %11, %12 : vector<16x1xf32>
    %14 = vector.broadcast %4 : vector<16x1xf32> to vector<16x32xf32>
    %15 = arith.subf %0, %14 : vector<16x32xf32>
    %cst_4 = arith.constant 9.99999996E-13 : f32
    %16 = vector.broadcast %cst_4 : f32 to vector<16x1xf32>
    %17 = arith.addf %13, %16 : vector<16x1xf32>
    %18 = math.rsqrt %17 : vector<16x1xf32>
    %19 = vector.broadcast %18 : vector<16x1xf32> to vector<16x32xf32>
    %20 = arith.mulf %15, %19 : vector<16x32xf32>
    %c0_5 = arith.constant 0 : index
    %c0_6 = arith.constant 0 : index
    %21 = vector.load %arg2[%c0_5, %c0_6] : memref<1x32xf32, #tpu.memory_space<vmem>>, vector<1x32xf32>
    %22 = vector.broadcast %21 : vector<1x32xf32> to vector<16x32xf32>
    %23 = arith.mulf %20, %22 : vector<16x32xf32>
    %c0_7 = arith.constant 0 : index
    %c0_8 = arith.constant 0 : index
    %24 = vector.load %arg3[%c0_7, %c0_8] : memref<1x32xf32, #tpu.memory_space<vmem>>, vector<1x32xf32>
    %25 = vector.broadcast %24 : vector<1x32xf32> to vector<16x32xf32>
    %26 = arith.addf %23, %25 : vector<16x32xf32>
    %c0_9 = arith.constant 0 : index
    %c0_10 = arith.constant 0 : index
    %27 = vector.load %arg4[%c0_9, %c0_10] : memref<16x32xf32, #tpu.memory_space<vmem>>, vector<16x32xf32>
    tpu.vector_store %arg4[%c0_9, %c0_10], %26 {strides = array<i32>} : memref<16x32xf32, #tpu.memory_space<vmem>>, vector<16x32xf32>,
    %28 = arith.truncf %26 : vector<16x32xf32> to vector<16x32xbf16>
    %c0_11 = arith.constant 0 : index
    %c0_12 = arith.constant 0 : index
    %29 = vector.load %arg5[%c0_11, %c0_12] : memref<16x32xbf16, #tpu.memory_space<vmem>>, vector<16x32xbf16>
    tpu.vector_store %arg5[%c0_11, %c0_12], %28 {strides = array<i32>} : memref<16x32xbf16, #tpu.memory_space<vmem>>, vector<16x32xbf16>,
    return
  }
  func.func @transform_0(%arg0: i32) -> (i32, i32) {
    %c0_i32 = arith.constant 0 : i32
    %c0_i32_0 = arith.constant 0 : i32
    return %arg0, %c0_i32 : i32, i32
  }
  func.func @transform_1(%arg0: i32) -> (i32, i32) {
    %c0_i32 = arith.constant 0 : i32
    %c0_i32_0 = arith.constant 0 : i32
    %c0_i32_1 = arith.constant 0 : i32
    return %c0_i32, %c0_i32_0 : i32, i32
  }
  func.func @transform_2(%arg0: i32) -> (i32, i32) {
    %c0_i32 = arith.constant 0 : i32
    %c0_i32_0 = arith.constant 0 : i32
    %c0_i32_1 = arith.constant 0 : i32
    return %c0_i32, %c0_i32_0 : i32, i32
  }
  func.func @transform_3(%arg0: i32) -> (i32, i32) {
    %c0_i32 = arith.constant 0 : i32
    %c0_i32_0 = arith.constant 0 : i32
    return %arg0, %c0_i32 : i32, i32
  }
  func.func @transform_4(%arg0: i32) -> (i32, i32) {
    %c0_i32 = arith.constant 0 : i32
    %c0_i32_0 = arith.constant 0 : i32
    return %arg0, %c0_i32 : i32, i32
  }
}

</mosaic_0001>

<bundles_post_ra>
// kernel: tpu_custom_call.1
= control target key start
LH: loop header
LB: loop body
LE: loop exit
PB: predicated region body
PF: predicated region fallthrough
CT: control target
= control target key end

     0   :  { %10 = vsyncpa [#allocation3], 0  ;;  %s310_s0 = inlined_call_operand.hbm [shape: f32[16,32], index: 0, kind: input, shape index: {}]   ;;  %s311_s1 = inlined_call_operand.vmem [shape: f32[1,32], index: 1, kind: input, shape index: {}]   ;;  %s312_s2 = inlined_call_operand.vmem [shape: f32[1,32], index: 2, kind: input, shape index: {}]   ;;  %s313_s3 = inlined_call_operand.hbm [shape: f32[16,32], index: 3, kind: output, shape index: {0}]   ;;  %s314_s4 = inlined_call_operand.hbm [shape: bf16[16,32], index: 4, kind: output, shape index: {1}]  }
   0x1   :  { %11 = vsyncpa [#allocation4], 0 }
   0x2   :  { %12 = vsyncpa [#allocation7], 0  ;;  %s215_s15 = smov [#allocation2]   ;;  %s143_s19 = scalar_lea.hbm %s310_s0, 256 }
   0x3   :  { %s18_s16 = sshll.u32 %s215_s15, 4  ;;  %p144_p0 = scmp.ne.s32.totalorder %s310_s0, %s143_s19  ;;  %s19_s16 = int_to_ptr.vmem [resolvable:$true] %s18_s16 }
   0x4   :  { %p147_p1 = scmp.lt.u32.totalorder %s143_s19, %s310_s0 }
   0x6   :  { %p149_p2 = pnand %p147_p1, %p144_p0 }
   0x8   :  { %152 = shalt.err (!%p149_p2)
}
   0x9   :  { %s153_s24 = scalar_lea.vmem %s19_s16, 256  ;;  %p158_p4 = scmp.lt.s32.totalorder %s19_s16, %s19_s16 }
   0xa   :  { %p154_p3 = scmp.ne.s32.totalorder %s19_s16, %s153_s24  ;;  %p159_p5 = scmp.lt.s32.totalorder %s153_s24, %s153_s24 }
   0xc   :  { %p160_p6 = por %p159_p5, %p158_p4 }
   0xe   :  { %p161_p7 = pnand %p160_p6, %p154_p3 }
  0x10   :  { %164 = shalt.err (!%p161_p7)
}
  0x11   :  { %s216_s25 = smov 128   ;;  %s217_s26 = smov 8  }
  0x12   :  { %24 = dma.hbm_to_vmem [thread:$0]  %s310_s0, 256, %s19_s16, [#allocation3], %s216_s25, %s216_s25, %s217_s26  }
  0x13   :  { %209 = dma.done.wait [#allocation3], 256  }
  0x14   :  { %210 = vsyncadd [#allocation3], 4294967040  ;;  %vm34_vm0 = vcmask 261120   ;;  %v32_v0 = vld [vmem:[#allocation2] sm:$0xff]  ;;  %v33_v1 = vld [vmem:[#allocation2 + $0x8] sm:$0xff]  ;;  %s218_s6 = smov [#allocation5]  }
  0x15   :  { %v35_v2 = vsel %vm34_vm0, %v32_v0, 0.0  ;;  %v38_v3 = vsel %vm34_vm0, %v33_v1, 0.0  ;;  %v126_v21 = vld [vmem:[%s311_s1] ss:$0 sm:$0xff]  ;;  %s98_s7 = sshll.u32 %s218_s6, 4  ;;  %vm90_vm1 = vcmask 257024   ;;  %s99_s7 = int_to_ptr.vmem [resolvable:$true] %s98_s7 }
  0x16   :  { %36 = vadd.xlane.f32.xlu0 %v35_v2  ;;  %v127_v23 = vld [vmem:[%s312_s2] ss:$0 sm:$0xff]  ;;  %s219_s8 = smov [#allocation6]   ;;  %s165_s1 = scalar_lea.vmem %s99_s7, 256 }
  0x17   :  { %s110_s9 = sshll.u32 %s219_s8, 4  ;;  %p166_p8 = scmp.ne.s32.totalorder %s99_s7, %s165_s1  ;;  %s274_s9 = int_to_ptr.vmem [resolvable:$true] %s110_s9 }
  0x18   :  { %p170_p9 = scmp.lt.s32.totalorder %s99_s7, %s99_s7  ;;  %p171_p10 = scmp.lt.s32.totalorder %s165_s1, %s165_s1 }
  0x1a   :  { %39 = vadd.xlane.f32.xlu0 %v38_v3  ;;  %p172_p11 = por %p171_p10, %p170_p9 }
  0x1c   :  { %p173_p12 = pnand %p172_p11, %p166_p8 }
  0xa3   :  { %v37_v4 = vpop.xlane.xlu0 %36 }
  0xa4   :  { %v42_v5 = vmul.f32 0.03125, %v37_v4 }
  0xa6   :  { %v44_v6 = vsub.f32 %v32_v0, %v42_v5 }
  0xa7   :  { %v40_v7 = vpop.xlane.xlu0 %39 }
  0xa8   :  { %v43_v8 = vmul.f32 0.03125, %v40_v7  ;;  %v46_v9 = vmul.f32 %v44_v6, %v44_v6 }
  0xaa   :  { %v45_v10 = vsub.f32 %v33_v1, %v43_v8  ;;  %v48_v11 = vsel %vm34_vm0, %v46_v9, 0.0 }
  0xab   :  { %49 = vadd.xlane.f32.xlu1 %v48_v11 }
  0xac   :  { %v47_v12 = vmul.f32 %v45_v10, %v45_v10 }
  0xae   :  { %v51_v13 = vsel %vm34_vm0, %v47_v12, 0.0 }
  0xaf   :  { %52 = vadd.xlane.f32.xlu1 %v51_v13 }
 0x138   :  { %v50_v14 = vpop.xlane.xlu1 %49 }
 0x139   :  { %v54_v15 = vmul.f32 0.03125, %v50_v14 }
 0x13b   :  { %v56_v16 = vadd.f32 1e-12, %v54_v15 }
 0x13c   :  { %v53_v17 = vpop.xlane.xlu1 %52 }
 0x13d   :  { %139 = vrsqrt.f32 %v56_v16  ;;  %v55_v18 = vmul.f32 0.03125, %v53_v17 }
 0x13f   :  { %v57_v19 = vadd.f32 1e-12, %v55_v18 }
 0x141   :  { %141 = vrsqrt.f32 %v57_v19 }
 0x147   :  { %v140_v20 = vpop.eup %139 }
 0x148   :  { %v60_v22 = vmul.f32 %v140_v20, %v44_v6 }
 0x14a   :  { %v69_v24 = vmul.f32 %v126_v21, %v60_v22 }
 0x14b   :  { %v142_v25 = vpop.eup %141 }
 0x14c   :  { %v61_v26 = vmul.f32 %v142_v25, %v45_v10  ;;  %v78_v27 = vadd.f32 %v127_v23, %v69_v24 }
 0x14e   :  { %v70_v28 = vmul.f32 %v126_v21, %v61_v26  ;;  %80 = vst.msk [vmem:[#allocation5] sm:$0xff] %vm34_vm0, %v78_v27  ;;  %v130_v29 = vpack.c.bf16 %v78_v27, %v78_v27 }
 0x150   :  { %v79_v30 = vadd.f32 %v127_v23, %v70_v28  ;;  %91 = vst.msk [vmem:[#allocation6] sm:$0xf] %vm90_vm1, %v130_v29 }
 0x152   :  { %81 = vst.msk [vmem:[#allocation5 + $0x8] sm:$0xff] %vm34_vm0, %v79_v30  ;;  %v131_v31 = vpack.c.bf16 %v79_v30, %v79_v30 }
 0x153   :  { %176 = shalt.err (!%p173_p12)
}
 0x154   :  { %s177_s11 = scalar_lea.hbm %s313_s3, 256 }
 0x155   :  { %p178_p13 = scmp.ne.s32.totalorder %s313_s3, %s177_s11  ;;  %p181_p0 = scmp.lt.u32.totalorder %s177_s11, %s313_s3 }
 0x157   :  { %p183_p1 = pnand %p181_p0, %p178_p13 }
 0x159   :  { %186 = shalt.err (!%p183_p1)
}
 0x15a   :  { %104 = dma.vmem_to_hbm [thread:$0]  %s99_s7, 256, %s313_s3, [#allocation4], %s216_s25, %s216_s25, %s217_s26   ;;  %92 = vst.msk [vmem:[#allocation6 + $0x4] sm:$0xf] %vm90_vm1, %v131_v31 }
 0x15b   :  { %s187_s18 = scalar_lea.vmem %s274_s9, 128  ;;  %p192_p3 = scmp.lt.s32.totalorder %s274_s9, %s274_s9 }
 0x15c   :  { %p188_p2 = scmp.ne.s32.totalorder %s274_s9, %s187_s18  ;;  %p193_p4 = scmp.lt.s32.totalorder %s187_s18, %s187_s18 }
 0x15e   :  { %p194_p5 = por %p193_p4, %p192_p3 }
 0x160   :  { %p195_p6 = pnand %p194_p5, %p188_p2 }
 0x162   :  { %198 = shalt.err (!%p195_p6)
}
 0x163   :  { %s199_s21 = scalar_lea.hbm %s314_s4, 128 }
 0x164   :  { %p200_p7 = scmp.ne.s32.totalorder %s314_s4, %s199_s21  ;;  %p203_p8 = scmp.lt.u32.totalorder %s199_s21, %s314_s4 }
 0x166   :  { %p205_p9 = pnand %p203_p8, %p200_p7 }
 0x168   :  { %208 = shalt.err (!%p205_p9)
}
 0x169   :  { %s220_s25 = smov 64   ;;  %s221_s26 = smov 4  }
 0x16a   :  { %116 = dma.vmem_to_hbm [thread:$0]  %s274_s9, 128, %s314_s4, [#allocation7], %s220_s25, %s220_s25, %s221_s26  }
 0x16b   :  { %211 = dma.done.wait [#allocation4], 256  }
 0x16c   :  { %212 = vsyncadd [#allocation4], 4294967040 }
 0x16d   :  { %213 = dma.done.wait [#allocation7], 128  }
 0x16e   :  { %214 = vsyncadd [#allocation7], 4294967168 }
 0x16f   :  { %123 = vsyncpa [#allocation3], 1 }
 0x170   :  { %124 = vsyncpa [#allocation4], 1 }
 0x171   :  { %125 = vsyncpa [#allocation7], 1 }

</bundles_post_ra>
